<compile_context>
chip_gen: v5e
topology: v5e:2x2
jax: 0.10.0
libtpu: 0.0.40
codegen_flags: <defaults>
</compile_context>

<pallas_src>
import functools

import jax
import jax.numpy as jnp
from jax.experimental import pallas as pl
from jax.experimental.pallas import tpu as pltpu

EPS = 1e-9
LANES = 128
SUBLANES = 8
CHUNK_ROWS = 512                      # strip-mine size inside one grid step
DEFAULT_TILE_BYTES = 4 * 1024 * 1024  # per-step DMA budget (safe on v5e/v6e/v7x)
BIG_TILE_BYTES = 8 * 1024 * 1024      # used when high-BW / 64 MiB-VMEM chip detected


def _tile_bytes_budget() -> int:
    """Pick a per-step DMA byte budget; bigger on v7x-class chips."""
    try:
        info = pltpu.get_tpu_info()
        # v7x has 64 MiB VMEM/TC (vs 128 MiB on v5e/v6e) and ~2.3x the HBM BW:
        # spend more bytes per step; 2 x 8 MiB still fits its 32 MiB default
        # scoped-VMEM limit.
        if info.vmem_capacity_bytes <= 64 * 1024 * 1024:
            return BIG_TILE_BYTES
    except Exception:
        pass
    return DEFAULT_TILE_BYTES


def _entropy_kernel(p_ref, acc_ref, *, valid_rows):
    """Accumulate sum(-p * log2(p + eps)) of this (tm, 128) block into acc_ref.

    acc_ref is the (8, 128) f32 output block, resident across the whole grid
    (constant out-block index, "arbitrary" reduction axis).
    """
    i = pl.program_id(0)
    tm = p_ref.shape[0]

    @pl.when(i == 0)
    def _():
        acc_ref[...] = jnp.zeros_like(acc_ref)

    def fold_chunk(start, size, masked):
        # `start` may be dynamic (loop counter) or a static int; `size` is static
        # and always a multiple of 8 (guaranteed by the wrapper).
        p = p_ref[pl.ds(start, size), :].astype(jnp.float32)
        if masked:
            row_ids = (i * tm + start
                       + jax.lax.broadcasted_iota(jnp.int32, p.shape, 0))
            # masked / garbage rows become 0 -> contribute exactly -0.0
            p = jnp.where(row_ids < valid_rows, p, jnp.float32(0.0))
        contrib = -(p * jnp.log2(p + jnp.float32(EPS)))
        # fold to one vreg-shaped (8, 128) partial: pure VPU adds, no XLU
        acc_ref[...] += contrib.reshape(size // SUBLANES, SUBLANES, LANES).sum(axis=0)

    def accumulate(masked):
        n_full, rem = divmod(tm, CHUNK_ROWS)
        if n_full > 0:
            @pl.loop(0, n_full)
            def _(c):
                fold_chunk(pl.multiple_of(c * CHUNK_ROWS, CHUNK_ROWS),
                           CHUNK_ROWS, masked)
        if rem > 0:
            fold_chunk(n_full * CHUNK_ROWS, rem, masked)

    if valid_rows is None:
        # rows % tm == 0: single hot path, never pays iota / where
        accumulate(masked=False)
    else:
        last = pl.num_programs(0) - 1

        @pl.when(i != last)
        def _():
            accumulate(masked=False)

        @pl.when(i == last)
        def _():
            accumulate(masked=True)  # only the partial last tile pays the mask


def entropy(joint_p: jax.Array) -> jax.Array:
    """Pallas TPU implementation of Entropy.forward (returns a scalar f32)."""
    flat = joint_p.reshape(-1)            # free: no transpose, no dtype change
    n = flat.shape[0]
    itemsize = int(flat.dtype.itemsize)

    # packed-dtype sublane granularity: (8,128) f32 / (16,128) bf16 / (32,128) i8
    sub = max(SUBLANES, 32 // max(itemsize, 1))

    rows = (n // LANES) // sub * sub      # rows streamed by the kernel
    n_main = rows * LANES

    # tiny ragged tail (< sub*128 + 128 elements): plain jnp, no full-tensor pad
    tail = None
    if n_main < n:
        pt = flat[n_main:].astype(jnp.float32)
        tail = -jnp.sum(pt * jnp.log2(pt + jnp.float32(EPS)))

    if rows == 0:
        return tail if tail is not None else jnp.float32(0.0)

    if n_main == n:
        mat = flat.reshape(rows, LANES)   # free reshape, zero extra HBM traffic
    else:
        # ragged fallback: aligned prefix only (may materialize a prefix copy,
        # still <= the old jnp.pad traffic and the tail stays tiny)
        mat = flat[:n_main].reshape(rows, LANES)

    # dtype-aware bytes-per-step tile budget (the real HBM-roofline lever)
    tile_bytes = _tile_bytes_budget()
    tm_target = max(sub, tile_bytes // (LANES * itemsize) // sub * sub)
    tm = min(tm_target, rows)             # multiple of `sub`, never exceeds array
    num_tiles = pl.cdiv(rows, tm)
    valid_rows = rows if rows % tm != 0 else None

    kernel = functools.partial(_entropy_kernel, valid_rows=valid_rows)

    acc = pl.pallas_call(
        kernel,
        out_shape=jax.ShapeDtypeStruct((SUBLANES, LANES), jnp.float32),
        grid=(num_tiles,),
        in_specs=[pl.BlockSpec((tm, LANES), lambda i: (i, 0))],
        out_specs=pl.BlockSpec((SUBLANES, LANES), lambda i: (0, 0)),
        compiler_params=pltpu.CompilerParams(
            dimension_semantics=("arbitrary",),
        ),
        cost_estimate=pl.CostEstimate(
            flops=3 * n_main,
            transcendentals=n_main,
            bytes_accessed=n_main * itemsize + SUBLANES * LANES * 4,
        ),
    )(mat)

    total = jnp.sum(acc)                  # single cross-lane reduce, in wrapper
    if tail is not None:
        total = total + tail
    return total


def entropy_ref(joint_p: jax.Array) -> jax.Array:
    p = joint_p.astype(jnp.float32)
    return -jnp.sum(p * jnp.log2(p + EPS))


if __name__ == "__main__":
    key = jax.random.PRNGKey(0)
    # small joint-probability-like tensor (NCHW-style shape), normalized to sum 1
    x = jax.random.uniform(key, (2, 4, 16, 16), dtype=jnp.float32)
    x = x / jnp.sum(x)

    result = jax.block_until_ready(entropy(x))
    expected = jax.block_until_ready(entropy_ref(x))

    assert jnp.allclose(result, expected, rtol=1e-5, atol=1e-5), (result, expected)
    print("KERNEL_OK")
</pallas_src>

<mosaic_0001>
module attributes {stable_mosaic.version = 11 : i64} {
  func.func @_entropy_kernel(%arg0: i32, %arg1: memref<16x128xf32, #tpu.memory_space<vmem>>, %arg2: memref<8x128xf32, #tpu.memory_space<vmem>>) attributes {dimension_semantics = [#tpu.dimension_semantics<arbitrary>], iteration_bounds = array<i64: 1>, scalar_prefetch = 0 : i64, scratch_operands = 0 : i64, tpu.core_type = #tpu.core_type<tc>, window_params = [{transform_indices = @transform_0, window_bounds = array<i64: 16, 128>}, {pipeline_mode = #tpu.pipeline_mode<synchronous>, transform_indices = @transform_1, window_bounds = array<i64: 8, 128>}]} {
    %c0_i32 = arith.constant 0 : i32
    %0 = arith.cmpi eq, %arg0, %c0_i32 : i32
    %1 = arith.extui %0 : i1 to i32
    %c0_i32_0 = arith.constant 0 : i32
    %2 = arith.cmpi ne, %1, %c0_i32_0 : i32
    scf.if %2 {
      %cst_9 = arith.constant 0.000000e+00 : f32
      %18 = vector.broadcast %cst_9 : f32 to vector<8x128xf32>
      %c0_10 = arith.constant 0 : index
      %c0_11 = arith.constant 0 : index
      %19 = vector.load %arg2[%c0_10, %c0_11] : memref<8x128xf32, #tpu.memory_space<vmem>>, vector<8x128xf32>
      tpu.vector_store %arg2[%c0_10, %c0_11], %18 {strides = array<i32>} : memref<8x128xf32, #tpu.memory_space<vmem>>, vector<8x128xf32>,
    } else {
    }
    %c0 = arith.constant 0 : index
    %c0_1 = arith.constant 0 : index
    %3 = vector.load %arg1[%c0, %c0_1] : memref<16x128xf32, #tpu.memory_space<vmem>>, vector<16x128xf32>
    %cst = arith.constant 9.99999971E-10 : f32
    %4 = vector.broadcast %cst : f32 to vector<16x128xf32>
    %5 = arith.addf %3, %4 : vector<16x128xf32>
    %6 = math.log %5 : vector<16x128xf32>
    %cst_2 = arith.constant 2.000000e+00 : f32
    %7 = math.log %cst_2 : f32
    %8 = vector.broadcast %7 : f32 to vector<16x128xf32>
    %9 = arith.divf %6, %8 : vector<16x128xf32>
    %10 = arith.mulf %3, %9 : vector<16x128xf32>
    %cst_3 = arith.constant 0.000000e+00 : f32
    %11 = vector.broadcast %cst_3 : f32 to vector<16x128xf32>
    %12 = arith.subf %11, %10 : vector<16x128xf32>
    %c0_4 = arith.constant 0 : index
    %c0_5 = arith.constant 0 : index
    %13 = vector.load %arg2[%c0_4, %c0_5] : memref<8x128xf32, #tpu.memory_space<vmem>>, vector<8x128xf32>
    %14 = vector.shape_cast %12 : vector<16x128xf32> to vector<2x8x128xf32>
    %cst_6 = arith.constant dense<0.000000e+00> : vector<8x128xf32>
    %15 = vector.multi_reduction <add>, %14, %cst_6 [0] : vector<2x8x128xf32> to vector<8x128xf32>
    %16 = arith.addf %13, %15 : vector<8x128xf32>
    %c0_7 = arith.constant 0 : index
    %c0_8 = arith.constant 0 : index
    %17 = vector.load %arg2[%c0_7, %c0_8] : memref<8x128xf32, #tpu.memory_space<vmem>>, vector<8x128xf32>
    tpu.vector_store %arg2[%c0_7, %c0_8], %16 {strides = array<i32>} : memref<8x128xf32, #tpu.memory_space<vmem>>, vector<8x128xf32>,
    return
  }
  func.func @transform_0(%arg0: i32) -> (i32, i32) {
    %c0_i32 = arith.constant 0 : i32
    %c0_i32_0 = arith.constant 0 : i32
    return %arg0, %c0_i32 : i32, i32
  }
  func.func @transform_1(%arg0: i32) -> (i32, i32) {
    %c0_i32 = arith.constant 0 : i32
    %c0_i32_0 = arith.constant 0 : i32
    %c0_i32_1 = arith.constant 0 : i32
    return %c0_i32, %c0_i32_0 : i32, i32
  }
}

</mosaic_0001>

<bundles_post_ra>
// kernel: tpu_custom_call.1
= control target key start
LH: loop header
LB: loop body
LE: loop exit
PB: predicated region body
PF: predicated region fallthrough
CT: control target
= control target key end

     0   :  { %6 = vsyncpa [#allocation3], 0  ;;  %s157_s0 = inlined_call_operand.hbm [shape: f32[16,128], index: 0, kind: input, shape index: {}]   ;;  %s158_s1 = inlined_call_operand.hbm [shape: f32[8,128], index: 1, kind: output, shape index: {}]  }
   0x1   :  { %7 = vsyncpa [#allocation4], 0  ;;  %s12_s8 = sshll.u32 %s157_s0, 4  ;;  %s136_s9 = smov [#allocation2]   ;;  %s13_s8 = int_to_ptr.hbm [resolvable:$true] %s12_s8 }
   0x2   :  { %s14_s10 = sshll.u32 %s136_s9, 4  ;;  %s137_s11 = smov 128   ;;  %s15_s10 = int_to_ptr.vmem [resolvable:$true] %s14_s10 }
   0x3   :  { %s138_s12 = smov 8  }
   0x4   :  { %20 = dma.hbm_to_vmem [thread:$0]  %s13_s8, 256, %s15_s10, [#allocation3], %s137_s11, %s137_s11, %s138_s12  }
   0x5   :  { %132 = dma.done.wait [#allocation3], 256  }
   0x6   :  { %133 = vsyncadd [#allocation3], 4294967040  ;;  %v139_v0 = vmov 0.6931472   ;;  %v30_v2 = vld [vmem:[#allocation2] sm:$0xff]  ;;  %v31_v3 = vld [vmem:[#allocation2 + $0x8] sm:$0xff] }
   0x7   :  { %78 = vrcp.f32 %v139_v0  ;;  %v32_v4 = vadd.f32 1e-09, %v30_v2  ;;  %v33_v5 = vadd.f32 1e-09, %v31_v3  ;;  %s140_s0 = smov [#allocation5]   ;;  %s62_s16 = sshll.u32 %s158_s1, 4  ;;  %s63_s16 = int_to_ptr.hbm [resolvable:$true] %s62_s16 }
   0x8   :  { %s60_s13 = sshll.u32 %s140_s0, 4  ;;  %s61_s13 = int_to_ptr.vmem [resolvable:$true] %s60_s13 }
   0x9   :  { %80 = vlog2.f32 %v32_v4 }
   0xa   :  { %82 = vlog2.f32 %v33_v5 }
   0xd   :  { %v79_v1 = vpop.eup %78 }
   0xe   :  { %v39_v6 = vmul.f32 0.6931472, %v79_v1  ;;  %vm43_vm0 = vweird.f32 %v79_v1 }
   0xf   :  { %v81_v10 = vpop.eup %80 }
  0x10   :  { %v40_v7 = vsub.f32 1.0, %v39_v6  ;;  %v83_v12 = vpop.eup %82  ;;  %v35_v13 = vmul.f32 0.6931472, %v81_v10 }
  0x11   :  { %v37_v14 = vmul.f32 0.6931472, %v83_v12 }
  0x12   :  { %v41_v8 = vmul.f32 %v79_v1, %v40_v7 }
  0x14   :  { %v42_v9 = vadd.f32 %v79_v1, %v41_v8 }
  0x16   :  { %v44_v11 = vsel %vm43_vm0, %v79_v1, %v42_v9 }
  0x17   :  { %v45_v15 = vmul.f32 %v44_v11, %v35_v13  ;;  %v46_v16 = vmul.f32 %v44_v11, %v37_v14 }
  0x19   :  { %v47_v17 = vmul.f32 %v45_v15, %v30_v2  ;;  %v48_v18 = vmul.f32 %v46_v16, %v31_v3 }
  0x1b   :  { %v49_v19 = vsub.f32 0.0, %v47_v17  ;;  %v50_v20 = vsub.f32 0.0, %v48_v18 }
  0x1d   :  { %v52_v21 = vadd.f32 %v50_v20, %v49_v19 }
  0x1f   :  { %54 = vst [vmem:[#allocation5] sm:$0xff] %v52_v21 }
  0x20   :  { %65 = dma.vmem_to_hbm [thread:$0]  %s61_s13, 128, %s63_s16, [#allocation4]  }
  0x21   :  { %134 = dma.done.wait [#allocation4], 128  }
  0x22   :  { %135 = vsyncadd [#allocation4], 4294967168 }
  0x23   :  { %70 = vsyncpa [#allocation3], 1 }
  0x24   :  { %71 = vsyncpa [#allocation4], 1 }

</bundles_post_ra>
